<compile_context>
chip_gen: v6e
topology: v6e:2x2x1
jax: 0.10.0
libtpu: 0.0.40
codegen_flags: <defaults>
</compile_context>

<pallas_src>
import functools

import jax
import jax.numpy as jnp
from jax import lax
from jax.experimental import pallas as pl
from jax.experimental.pallas import tpu as pltpu


def _act(h, activation, slope):
    if activation == "lrelu":
        return jnp.where(h > 0, h, slope * h)
    if activation == "xtanh":
        return jnp.tanh(h) + slope * h
    if activation == "sigmoid":
        return jax.nn.sigmoid(h)
    return h  # 'none'


def gaussian_mlp_kernel(*refs, slope, activation, n_layers, widths, out_dim,
                        compute_dtype):
    """Fused two-headed MLP.

    refs = (x_ref, w0_ref, ..., w{n-1}_ref, bias_pack_ref, out_ref).
    Each fused weight w{c} carries both heads (concat for layer 0, block-diag
    for deeper layers), so one dot per layer advances both heads at once.
    """
    x_ref = refs[0]
    w_refs = refs[1:1 + n_layers]
    b_ref = refs[1 + n_layers]
    out_ref = refs[-1]

    h = x_ref[...]
    for c in range(n_layers):
        b = b_ref[c:c + 1, :widths[c]]                      # static slice
        h = jnp.dot(h.astype(compute_dtype), w_refs[c][...],
                    preferred_element_type=jnp.float32) + b
        if c != n_layers - 1:
            h = _act(h, activation, slope)                  # f32 elementwise

    # Lanes [0, out_dim) = mean head (identity); lanes [out_dim, 2*out_dim) =
    # log_var head, var = exp(log_var). exp on the discarded half is EUP
    # filler (separate bundle slot) and the where selects cleanly.
    col = lax.broadcasted_iota(jnp.int32, h.shape, dimension=1)
    out_ref[...] = jnp.where(col < out_dim, h, jnp.exp(h)).astype(out_ref.dtype)


def _block_diag(a, b):
    top = jnp.concatenate([a, jnp.zeros((a.shape[0], b.shape[1]), a.dtype)], axis=1)
    bot = jnp.concatenate([jnp.zeros((b.shape[0], a.shape[1]), b.dtype), b], axis=1)
    return jnp.concatenate([top, bot], axis=0)


def _pack_params(params):
    """Fuse the two heads into per-layer weight slabs + one packed bias buffer."""
    mean_layers = params["mean"]
    lv_layers = params["log_var"]
    assert len(mean_layers) == len(lv_layers)
    n_layers = len(mean_layers)

    ws, bs, widths = [], [], []
    for c in range(n_layers):
        wm, bm = mean_layers[c]
        wv, bv = lv_layers[c]
        if c == 0:
            w = jnp.concatenate([wm, wv], axis=1)           # shared input -> (in, 2H)
        else:
            w = _block_diag(wm, wv)                         # independent heads
        b = jnp.concatenate([bm, bv], axis=1)
        ws.append(w)
        bs.append(b)
        widths.append(b.shape[1])

    max_w = max(widths)
    b_packed = jnp.concatenate(
        [jnp.pad(b, ((0, 0), (0, max_w - b.shape[1]))) for b in bs], axis=0)
    return ws, b_packed, tuple(widths)


def gaussian_mlp_forward(x, u, params, *, slope=0.1, activation="lrelu",
                         batch_tile=128, use_bf16=False):
    """Returns (mean, var) exactly like GaussianMLP.forward(x, u)."""
    del u  # unused (see module-level note)
    B, in_dim = x.shape
    out_dim = params["mean"][-1][0].shape[1]

    ws, b_packed, widths = _pack_params(params)
    n_layers = len(ws)
    fused_out = 2 * out_dim

    compute_dtype = jnp.bfloat16 if use_bf16 else jnp.float32
    if use_bf16:
        # bf16 into the MXU (f32 accumulation); biases / elementwise stay f32.
        ws = [w.astype(jnp.bfloat16) for w in ws]
        x_in = x.astype(jnp.bfloat16)
    else:
        x_in = x

    # Pad the batch instead of asserting; whole batch in one grid step when it
    # is small, otherwise batch_tile rows per step (amortizes per-step cost).
    def round_up(a, m):
        return (a + m - 1) // m * m

    tile = min(batch_tile, round_up(B, 8))
    B_pad = round_up(B, tile)
    if B_pad != B:
        x_in = jnp.pad(x_in, ((0, B_pad - B), (0, 0)))

    kernel = functools.partial(
        gaussian_mlp_kernel, slope=slope, activation=activation,
        n_layers=n_layers, widths=widths, out_dim=out_dim,
        compute_dtype=compute_dtype)

    def resident(arr):  # whole (small) parameter tensor resident for all steps
        return pl.BlockSpec(arr.shape, lambda i: (0, 0))

    in_specs = [pl.BlockSpec((tile, in_dim), lambda i: (i, 0))]
    in_specs += [resident(w) for w in ws]
    in_specs += [resident(b_packed)]

    fused = pl.pallas_call(
        kernel,
        out_shape=jax.ShapeDtypeStruct((B_pad, fused_out), jnp.float32),
        grid_spec=pltpu.PrefetchScalarGridSpec(
            num_scalar_prefetch=0,
            grid=(B_pad // tile,),
            in_specs=in_specs,
            out_specs=pl.BlockSpec((tile, fused_out), lambda i: (i, 0)),
        ),
        compiler_params=pltpu.CompilerParams(
            dimension_semantics=("parallel",),
        ),
    )(x_in, *ws, b_packed)

    mean = fused[:B, :out_dim]
    var = fused[:B, out_dim:]
    return mean, var


def init_mlp_params(key, input_dim, output_dim, hidden_dim, n_layers):
    """Deterministic init mimicking nn.Linear's U(-1/sqrt(fan_in), 1/sqrt(fan_in)).

    Weights are returned as (in, out); biases as (1, out).
    """
    dims = [input_dim] + [hidden_dim] * (n_layers - 1) + [output_dim]
    layers = []
    for i in range(n_layers):
        fan_in, fan_out = dims[i], dims[i + 1]
        key, kw, kb = jax.random.split(key, 3)
        bound = 1.0 / jnp.sqrt(fan_in)
        w = jax.random.uniform(kw, (fan_in, fan_out), jnp.float32, -bound, bound)
        b = jax.random.uniform(kb, (1, fan_out), jnp.float32, -bound, bound)
        layers.append((w, b))
    return key, layers


def reference_forward(x, params, slope=0.1):
    """Plain-JAX reference of the two-headed MLP for a correctness check."""
    def mlp(h, layers):
        n = len(layers)
        for c, (w, b) in enumerate(layers):
            h = h @ w + b
            if c != n - 1:
                h = jnp.where(h > 0, h, slope * h)
        return h
    mean = mlp(x, params["mean"])
    var = jnp.exp(mlp(x, params["log_var"]))
    return mean, var


if __name__ == "__main__":
    # GaussianMLP(input_dim=16, output_dim=8, hidden_dim=32, n_layers=3,
    #             activation='lrelu', slope=0.1)
    input_dim, output_dim, hidden_dim, n_layers = 16, 8, 32, 3
    slope = 0.1
    batch = 16

    key = jax.random.PRNGKey(0)
    key, mean_layers = init_mlp_params(key, input_dim, output_dim, hidden_dim, n_layers)
    key, logvar_layers = init_mlp_params(key, input_dim, output_dim, hidden_dim, n_layers)
    params = {"mean": mean_layers, "log_var": logvar_layers}

    key, kx, ku = jax.random.split(key, 3)
    x = jax.random.normal(kx, (batch, input_dim), jnp.float32)
    u = jax.random.normal(ku, (batch, 4), jnp.float32)  # ignored, see note above

    # f32 path: bit-accurate against the plain-JAX reference.
    mean, var = gaussian_mlp_forward(x, u, params, slope=slope)
    jax.block_until_ready((mean, var))

    ref_mean, ref_var = reference_forward(x, params, slope=slope)
    assert mean.shape == (batch, output_dim) and var.shape == (batch, output_dim)
    assert jnp.allclose(mean, ref_mean, atol=1e-5, rtol=1e-5)
    assert jnp.allclose(var, ref_var, atol=1e-5, rtol=1e-5)

    # bf16 MXU fast path (v6e/v7x); loose tolerance for bf16 input rounding.
    mean16, var16 = gaussian_mlp_forward(x, u, params, slope=slope, use_bf16=True)
    jax.block_until_ready((mean16, var16))
    assert jnp.allclose(mean16, ref_mean, atol=0.1, rtol=0.1)
    assert jnp.allclose(var16, ref_var, atol=0.1, rtol=0.1)

    print("KERNEL_OK")
</pallas_src>

<mosaic_0001>
module attributes {stable_mosaic.version = 11 : i64} {
  func.func @gaussian_mlp_kernel(%arg0: i32, %arg1: memref<16x16xf32, #tpu.memory_space<vmem>>, %arg2: memref<16x64xf32, #tpu.memory_space<vmem>>, %arg3: memref<64x64xf32, #tpu.memory_space<vmem>>, %arg4: memref<64x16xf32, #tpu.memory_space<vmem>>, %arg5: memref<3x64xf32, #tpu.memory_space<vmem>>, %arg6: memref<16x16xf32, #tpu.memory_space<vmem>>) attributes {dimension_semantics = [#tpu.dimension_semantics<parallel>], iteration_bounds = array<i64: 1>, scalar_prefetch = 0 : i64, scratch_operands = 0 : i64, tpu.core_type = #tpu.core_type<tc>, window_params = [{transform_indices = @transform_0, window_bounds = array<i64: 16, 16>}, {pipeline_mode = #tpu.pipeline_mode<synchronous>, transform_indices = @transform_1, window_bounds = array<i64: 16, 64>}, {pipeline_mode = #tpu.pipeline_mode<synchronous>, transform_indices = @transform_2, window_bounds = array<i64: 64, 64>}, {pipeline_mode = #tpu.pipeline_mode<synchronous>, transform_indices = @transform_3, window_bounds = array<i64: 64, 16>}, {pipeline_mode = #tpu.pipeline_mode<synchronous>, transform_indices = @transform_4, window_bounds = array<i64: 3, 64>}, {transform_indices = @transform_5, window_bounds = array<i64: 16, 16>}]} {
    %c0 = arith.constant 0 : index
    %c0_0 = arith.constant 0 : index
    %0 = vector.load %arg1[%c0, %c0_0] : memref<16x16xf32, #tpu.memory_space<vmem>>, vector<16x16xf32>
    %c0_1 = arith.constant 0 : index
    %c0_2 = arith.constant 0 : index
    %1 = vector.load %arg5[%c0_1, %c0_2] : memref<3x64xf32, #tpu.memory_space<vmem>>, vector<1x64xf32>
    %c0_3 = arith.constant 0 : index
    %c0_4 = arith.constant 0 : index
    %2 = vector.load %arg2[%c0_3, %c0_4] : memref<16x64xf32, #tpu.memory_space<vmem>>, vector<16x64xf32>
    %cst = arith.constant dense<0.000000e+00> : vector<16x64xf32>
    %3 = tpu.matmul %0, %2, %cst {dimension_numbers = #tpu.dot_dimension_numbers<[1], [0], [0], [1], [0, 0, 1, 1], [], []>} : vector<16x16xf32>, vector<16x64xf32>, vector<16x64xf32> -> vector<16x64xf32>
    %4 = vector.broadcast %1 : vector<1x64xf32> to vector<16x64xf32>
    %5 = arith.addf %3, %4 : vector<16x64xf32>
    %cst_5 = arith.constant 0.000000e+00 : f32
    %6 = vector.broadcast %cst_5 : f32 to vector<16x64xf32>
    %7 = arith.cmpf ogt, %5, %6 : vector<16x64xf32>
    %cst_6 = arith.constant 1.000000e-01 : f32
    %8 = vector.broadcast %cst_6 : f32 to vector<16x64xf32>
    %9 = arith.mulf %8, %5 : vector<16x64xf32>
    %10 = arith.select %7, %5, %9 : vector<16x64xi1>, vector<16x64xf32>
    %c1 = arith.constant 1 : index
    %c0_7 = arith.constant 0 : index
    %11 = vector.load %arg5[%c1, %c0_7] : memref<3x64xf32, #tpu.memory_space<vmem>>, vector<1x64xf32>
    %c0_8 = arith.constant 0 : index
    %c0_9 = arith.constant 0 : index
    %12 = vector.load %arg3[%c0_8, %c0_9] : memref<64x64xf32, #tpu.memory_space<vmem>>, vector<64x64xf32>
    %cst_10 = arith.constant dense<0.000000e+00> : vector<16x64xf32>
    %13 = tpu.matmul %10, %12, %cst_10 {dimension_numbers = #tpu.dot_dimension_numbers<[1], [0], [0], [1], [0, 0, 1, 1], [], []>} : vector<16x64xf32>, vector<64x64xf32>, vector<16x64xf32> -> vector<16x64xf32>
    %14 = vector.broadcast %11 : vector<1x64xf32> to vector<16x64xf32>
    %15 = arith.addf %13, %14 : vector<16x64xf32>
    %cst_11 = arith.constant 0.000000e+00 : f32
    %16 = vector.broadcast %cst_11 : f32 to vector<16x64xf32>
    %17 = arith.cmpf ogt, %15, %16 : vector<16x64xf32>
    %cst_12 = arith.constant 1.000000e-01 : f32
    %18 = vector.broadcast %cst_12 : f32 to vector<16x64xf32>
    %19 = arith.mulf %18, %15 : vector<16x64xf32>
    %20 = arith.select %17, %15, %19 : vector<16x64xi1>, vector<16x64xf32>
    %c2 = arith.constant 2 : index
    %c0_13 = arith.constant 0 : index
    %21 = vector.load %arg5[%c2, %c0_13] : memref<3x64xf32, #tpu.memory_space<vmem>>, vector<1x16xf32>
    %c0_14 = arith.constant 0 : index
    %c0_15 = arith.constant 0 : index
    %22 = vector.load %arg4[%c0_14, %c0_15] : memref<64x16xf32, #tpu.memory_space<vmem>>, vector<64x16xf32>
    %cst_16 = arith.constant dense<0.000000e+00> : vector<16x16xf32>
    %23 = tpu.matmul %20, %22, %cst_16 {dimension_numbers = #tpu.dot_dimension_numbers<[1], [0], [0], [1], [0, 0, 1, 1], [], []>} : vector<16x64xf32>, vector<64x16xf32>, vector<16x16xf32> -> vector<16x16xf32>
    %24 = vector.broadcast %21 : vector<1x16xf32> to vector<16x16xf32>
    %25 = arith.addf %23, %24 : vector<16x16xf32>
    %26 = tpu.iota {dimensions = array<i32: 1>} : vector<16x16xi32>
    %c8_i32 = arith.constant 8 : i32
    %27 = vector.broadcast %c8_i32 : i32 to vector<16x16xi32>
    %28 = arith.cmpi slt, %26, %27 : vector<16x16xi32>
    %29 = math.exp %25 : vector<16x16xf32>
    %30 = arith.select %28, %25, %29 : vector<16x16xi1>, vector<16x16xf32>
    %c0_17 = arith.constant 0 : index
    %c0_18 = arith.constant 0 : index
    %31 = vector.load %arg6[%c0_17, %c0_18] : memref<16x16xf32, #tpu.memory_space<vmem>>, vector<16x16xf32>
    tpu.vector_store %arg6[%c0_17, %c0_18], %30 {strides = array<i32>} : memref<16x16xf32, #tpu.memory_space<vmem>>, vector<16x16xf32>,
    return
  }
  func.func @transform_0(%arg0: i32) -> (i32, i32) {
    %c0_i32 = arith.constant 0 : i32
    %c0_i32_0 = arith.constant 0 : i32
    return %arg0, %c0_i32 : i32, i32
  }
  func.func @transform_1(%arg0: i32) -> (i32, i32) {
    %c0_i32 = arith.constant 0 : i32
    %c0_i32_0 = arith.constant 0 : i32
    %c0_i32_1 = arith.constant 0 : i32
    return %c0_i32, %c0_i32_0 : i32, i32
  }
  func.func @transform_2(%arg0: i32) -> (i32, i32) {
    %c0_i32 = arith.constant 0 : i32
    %c0_i32_0 = arith.constant 0 : i32
    %c0_i32_1 = arith.constant 0 : i32
    return %c0_i32, %c0_i32_0 : i32, i32
  }
  func.func @transform_3(%arg0: i32) -> (i32, i32) {
    %c0_i32 = arith.constant 0 : i32
    %c0_i32_0 = arith.constant 0 : i32
    %c0_i32_1 = arith.constant 0 : i32
    return %c0_i32, %c0_i32_0 : i32, i32
  }
  func.func @transform_4(%arg0: i32) -> (i32, i32) {
    %c0_i32 = arith.constant 0 : i32
    %c0_i32_0 = arith.constant 0 : i32
    %c0_i32_1 = arith.constant 0 : i32
    return %c0_i32, %c0_i32_0 : i32, i32
  }
  func.func @transform_5(%arg0: i32) -> (i32, i32) {
    %c0_i32 = arith.constant 0 : i32
    %c0_i32_0 = arith.constant 0 : i32
    return %arg0, %c0_i32 : i32, i32
  }
}

</mosaic_0001>

<bundles_post_ra>
// kernel: tpu_custom_call.1
= control target key start
LH: loop header
LB: loop body
LE: loop exit
PB: predicated region body
PF: predicated region fallthrough
CT: control target
= control target key end

     0   :  { %10 = vsyncpa [#allocation3], 0  ;;  %s602_s0 = inlined_call_operand.vmem [shape: f32[16,16], index: 0, kind: input, shape index: {}]   ;;  %s603_s1 = inlined_call_operand.hbm [shape: f32[16,64], index: 1, kind: input, shape index: {}]   ;;  %s604_s2 = inlined_call_operand.vmem [shape: f32[64,64], index: 2, kind: input, shape index: {}]   ;;  %s605_s3 = inlined_call_operand.vmem [shape: f32[64,16], index: 3, kind: input, shape index: {}]   ;;  %s606_s4 = inlined_call_operand.vmem [shape: f32[3,64], index: 4, kind: input, shape index: {}]   ;;  %s607_s5 = inlined_call_operand.hbm [shape: f32[16,16], index: 5, kind: output, shape index: {}]  }
   0x1   :  { %11 = vsyncpa [#allocation4], 0  ;;  %s485_s18 = smov [#allocation2]  }
   0x2   :  { %s19_s19 = sshll.u32 %s485_s18, 4  ;;  %s20_s19 = int_to_ptr.vmem [resolvable:$true] %s19_s19 }
   0x3   :  { %s449_s20 = scalar_lea.vmem %s20_s19, 256  ;;  %p454_p1 = scmp.lt.s32.totalorder %s20_s19, %s20_s19 }
   0x4   :  { %p450_p0 = scmp.ne.s32.totalorder %s20_s19, %s449_s20  ;;  %p455_p2 = scmp.lt.s32.totalorder %s449_s20, %s449_s20 }
   0x6   :  { %p456_p3 = por %p455_p2, %p454_p1 }
   0x8   :  { %p457_p4 = pnand %p456_p3, %p450_p0 }
   0xa   :  { %460 = shalt.err (!%p457_p4)
}
   0xb   :  { %s486_s21 = smov 128   ;;  %s487_s22 = smov 8  }
   0xc   :  { %25 = dma.hbm_to_vmem [thread:$0]  %s603_s1, 256, %s20_s19, [#allocation3], %s486_s21, %s486_s21, %s487_s22  }
   0xd   :  { %481 = dma.done.wait [#allocation3], 256  }
   0xe   :  { %482 = vsyncadd [#allocation3], 4294967040  ;;  %vm44_vm0 = vcmask 130048   ;;  %v39_v0 = vld [vmem:[#allocation2 + $0x8] sm:$0xff]  ;;  %v38_v1 = vld [vmem:[#allocation2] sm:$0xff]  ;;  %vm145_vm3 = vcmask 523264   ;;  %v327_v45 = vlaneseq }
   0xf   :  { %v35_v2 = vld [vmem:[%s602_s0] sm:$0xff]  ;;  %388 = vmatprep.subr.mxu0 %v39_v0  ;;  %v140_v3 = vld [vmem:[%s604_s2 + $0x38] sm:$0xff]  ;;  %v139_v4 = vld [vmem:[%s604_s2 + $0x30] sm:$0xff]  ;;  %s488_s13 = smov [#allocation5]  }
  0x10   :  { %392 = vmatprep.mubr.msk.f32.mxu0 %vm44_vm0, %v35_v2  ;;  %389 = vmatpush3.msra.mxu0 %v39_v0  ;;  %v36_v5 = vld [vmem:[%s602_s0 + $0x8] sm:$0xff]  ;;  %v137_v7 = vld [vmem:[%s604_s2 + $0x20] sm:$0xff]  ;;  %v136_v8 = vld [vmem:[%s604_s2 + $0x18] sm:$0xff]  ;;  %v328_v46 = vand.u32 127, %v327_v45  ;;  %s343_s14 = sshll.u32 %s488_s13, 4  ;;  %s344_s14 = int_to_ptr.vmem [resolvable:$true] %s343_s14 }
  0x11   :  { %395 = vmatprep.subr.mxu1 %v140_v3  ;;  %390 = vmatprep.subr.mxu0 %v38_v1  ;;  %v138_v6 = vld [vmem:[%s604_s2 + $0x28] sm:$0xff]  ;;  %v135_v9 = vld [vmem:[%s604_s2 + $0x10] sm:$0xff]  ;;  %v133_v11 = vld [vmem:[%s604_s2] sm:$0xff]  ;;  %p466_p6 = scmp.lt.s32.totalorder %s344_s14, %s344_s14 }
  0x12   :  { %396 = vmatpush3.msra.mxu1 %v140_v3  ;;  %391 = vmatpush3.msra.mxu0 %v38_v1  ;;  %v134_v10 = vld [vmem:[%s604_s2 + $0x8] sm:$0xff]  ;;  %v241_v12 = vld [vmem:[%s605_s3 + $0x38] sm:$0xff]  ;;  %v240_v13 = vld [vmem:[%s605_s3 + $0x30] sm:$0xff]  ;;  %vm329_vm6 = vcmp.lt.s32.totalorder %v328_v46, 8 }
  0x13   :  { %397 = vmatprep.subr.mxu1 %v139_v4  ;;  %393 = vmatmul.mubr.msk.f32.vlgmr.msra.gmra.mxu0 %vm44_vm0, %v36_v5  ;;  %v239_v14 = vld [vmem:[%s605_s3 + $0x28] sm:$0xff]  ;;  %v238_v15 = vld [vmem:[%s605_s3 + $0x20] sm:$0xff]  ;;  %v237_v25 = vld [vmem:[%s605_s3 + $0x18] sm:$0xff] }
  0x14   :  { %398 = vmatpush3.msra.mxu1 %v139_v4  ;;  %414 = vmatprep.subr.mxu0 %v241_v12  ;;  %v355_v16 = vld [vmem:[%s606_s4] ss:$0 sm:$0xff]  ;;  %v236_v26 = vld [vmem:[%s605_s3 + $0x10] sm:$0xff]  ;;  %v235_v27 = vld [vmem:[%s605_s3 + $0x8] sm:$0xff] }
  0x15   :  { %399 = vmatprep.subr.mxu1 %v138_v6  ;;  %415 = vmatpush3.msra.mxu0 %v241_v12  ;;  %v234_v28 = vld [vmem:[%s605_s3] sm:$0xff] }
  0x16   :  { %400 = vmatpush3.msra.mxu1 %v138_v6  ;;  %416 = vmatprep.subr.mxu0 %v240_v13  ;;  %v358_v29 = vld [vmem:[%s606_s4 + $0x1] ss:$0 sm:$0xff]  ;;  %v361_v38 = vld [vmem:[%s606_s4 + $0x2] ss:$0 sm:$0xff]  ;;  %s461_s4 = scalar_lea.vmem %s344_s14, 256 }
  0x17   :  { %401 = vmatprep.subr.mxu1 %v137_v7  ;;  %417 = vmatpush3.msra.mxu0 %v240_v13  ;;  %p462_p5 = scmp.ne.s32.totalorder %s344_s14, %s461_s4  ;;  %p467_p7 = scmp.lt.s32.totalorder %s461_s4, %s461_s4 }
  0x18   :  { %402 = vmatpush3.msra.mxu1 %v137_v7  ;;  %418 = vmatprep.subr.mxu0 %v239_v14 }
  0x19   :  { %403 = vmatprep.subr.mxu1 %v136_v8  ;;  %419 = vmatpush3.msra.mxu0 %v239_v14  ;;  %p468_p8 = por %p467_p7, %p466_p6 }
  0x1a   :  { %404 = vmatpush3.msra.mxu1 %v136_v8  ;;  %420 = vmatprep.subr.mxu0 %v238_v15 }
  0x1b   :  { %405 = vmatprep.subr.mxu1 %v135_v9  ;;  %421 = vmatpush3.msra.mxu0 %v238_v15  ;;  %p469_p9 = pnand %p468_p8, %p462_p5 }
  0x1c   :  { %406 = vmatpush3.msra.mxu1 %v135_v9  ;;  %422 = vmatprep.subr.mxu0 %v237_v25 }
  0x1d   :  { %407 = vmatprep.subr.mxu1 %v134_v10  ;;  %423 = vmatpush3.msra.mxu0 %v237_v25 }
  0x1e   :  { %408 = vmatpush3.msra.mxu1 %v134_v10  ;;  %424 = vmatprep.subr.mxu0 %v236_v26 }
  0x1f   :  { %409 = vmatprep.subr.mxu1 %v133_v11  ;;  %425 = vmatpush3.msra.mxu0 %v236_v26 }
  0x20   :  { %410 = vmatpush3.msra.mxu1 %v133_v11  ;;  %426 = vmatprep.subr.mxu0 %v235_v27 }
  0x21   :  { %427 = vmatpush3.msra.mxu0 %v235_v27 }
  0x22   :  { %428 = vmatprep.subr.mxu0 %v234_v28 }
  0x23   :  { %429 = vmatpush3.msra.mxu0 %v234_v28 }
  0xd3   :  { %v394_v17 = vpop.f32.mrf.mxu0 }
  0xd4   :  { %v123_v18 = vadd.f32 %v394_v17, %v355_v16 }
  0xd5   :  { %v117_v19 = vpop.f32.mrf.mxu0 }
  0xd6   :  { %v118_v20 = vadd.f32 %v355_v16, %v117_v19  ;;  %v129_v21 = vmul.f32 0.1, %v123_v18  ;;  %vm127_vm1 = vcmp.gt.f32.partialorder %v123_v18, 0.0 }
  0xd8   :  { %vm126_vm2 = vcmp.gt.f32.partialorder %v118_v20, 0.0  ;;  %v128_v22 = vmul.f32 0.1, %v118_v20  ;;  %v131_v24 = vsel %vm127_vm1, %v123_v18, %v129_v21 }
  0xda   :  { %v130_v23 = vsel %vm126_vm2, %v118_v20, %v128_v22 }
  0xdb   :  { %411 = vmatprep.mubr.msk.f32.mxu1 %vm145_vm3, %v130_v23 }
  0xdc   :  { %412 = vmatmul.mubr.msk.f32.vlgmr.msra.gmra.mxu1 %vm145_vm3, %v131_v24 }
 0x19c   :  { %v413_v30 = vpop.f32.mrf.mxu1 }
 0x19d   :  { %v224_v31 = vadd.f32 %v413_v30, %v358_v29 }
 0x19e   :  { %v218_v32 = vpop.f32.mrf.mxu1 }
 0x19f   :  { %v219_v33 = vadd.f32 %v358_v29, %v218_v32  ;;  %v230_v34 = vmul.f32 0.1, %v224_v31  ;;  %vm228_vm4 = vcmp.gt.f32.partialorder %v224_v31, 0.0 }
 0x1a1   :  { %vm227_vm5 = vcmp.gt.f32.partialorder %v219_v33, 0.0  ;;  %v229_v35 = vmul.f32 0.1, %v219_v33  ;;  %v232_v37 = vsel %vm228_vm4, %v224_v31, %v230_v34 }
 0x1a3   :  { %v231_v36 = vsel %vm227_vm5, %v219_v33, %v229_v35 }
 0x1a4   :  { %430 = vmatprep.mubr.msk.f32.mxu0 %vm145_vm3, %v231_v36 }
 0x1a5   :  { %431 = vmatmul.mubr.msk.f32.vlgmr.msra.gmra.mxu0 %vm145_vm3, %v232_v37 }
 0x265   :  { %v432_v39 = vpop.f32.mrf.mxu0 }
 0x266   :  { %v324_v40 = vadd.f32 %v432_v39, %v361_v38 }
 0x267   :  { %v318_v41 = vpop.f32.mrf.mxu0 }
 0x268   :  { %v332_v42 = vmul.f32 1.442695, %v324_v40  ;;  %v319_v43 = vadd.f32 %v361_v38, %v318_v41 }
 0x26a   :  { %437 = vpow2.f32 %v332_v42  ;;  %v330_v44 = vmul.f32 1.442695, %v319_v43 }
 0x26c   :  { %439 = vpow2.f32 %v330_v44 }
 0x277   :  { %v438_v47 = vpop.eup %437 }
 0x278   :  { %v335_v48 = vsel %vm329_vm6, %v324_v40, %v438_v47 }
 0x279   :  { %v440_v49 = vpop.eup %439  ;;  %337 = vst.msk [vmem:[#allocation5 + $0x8] sm:$0xff] %vm44_vm0, %v335_v48 }
 0x27a   :  { %v334_v50 = vsel %vm329_vm6, %v319_v43, %v440_v49 }
 0x27b   :  { %336 = vst.msk [vmem:[#allocation5] sm:$0xff] %vm44_vm0, %v334_v50 }
 0x27c   :  { %472 = shalt.err (!%p469_p9)
}
 0x27d   :  { %349 = dma.vmem_to_hbm [thread:$0]  %s344_s14, 256, %s607_s5, [#allocation4], %s486_s21, %s486_s21, %s487_s22  }
 0x27e   :  { %483 = dma.done.wait [#allocation4], 256  }
 0x27f   :  { %484 = vsyncadd [#allocation4], 4294967040 }
 0x280   :  { %353 = vsyncpa [#allocation3], 1 }
 0x281   :  { %354 = vsyncpa [#allocation4], 1 }

</bundles_post_ra>
